<compile_context>
chip_gen: v5e
topology: v5e:2x2
jax: 0.10.0
libtpu: 0.0.40
codegen_flags: <defaults>
</compile_context>

<pallas_src>
import jax
import jax.numpy as jnp
from jax.experimental import pallas as pl
from jax.experimental.pallas import tpu as pltpu

LANES = 128
SUBLANES = 8


def _linear_kernel(w_ref, b_ref, x_ref, o_ref):
    # w_ref, b_ref: (1,) f32 scalars in SMEM (VPU broadcasts them).
    # x_ref, o_ref: (block_rows, 128) f32 tiles in VMEM (lane-dense).
    o_ref[...] = x_ref[...] * w_ref[0] + b_ref[0]


def linear_1x1(x, w, b, *, block_rows=2048, min_pallas_elems=8192,
               force_pallas=False):
    """Forward pass of nn.Linear(1, 1): y = x @ W^T + b.

    x: (N, 1), w: (1, 1) (Linear weight), b: (1,) (Linear bias).
    Returns (N, 1) with x.dtype.
    """
    n = x.shape[0]
    w_s = w.reshape(1).astype(x.dtype)  # scalar weight
    b_s = b.reshape(1).astype(x.dtype)  # scalar bias

    # Small-N fast path: a fused XLA elementwise op is strictly faster than a
    # custom-call launch + pipeline prologue until HBM streaming dominates.
    if not force_pallas and n < min_pallas_elems:
        return x * w_s[0] + b_s[0]

    # ---- Lane-dense repack: flatten (N, 1) -> (rows, 128) f32 slab ----------
    rows = pl.cdiv(n, LANES)
    x_flat = x.reshape(-1)
    padded = (rows * LANES) != n
    if padded:
        # Only the ragged tail (< 128 elems) is padded; aligned N costs nothing.
        x_flat = jnp.pad(x_flat, (0, rows * LANES - n))
    x2d = x_flat.reshape(rows, LANES)  # reshape of contiguous data: free

    # ---- Row tiling ----------------------------------------------------------
    if rows <= block_rows:
        br = rows                           # single block == full row dim (always legal)
    else:
        br = max(SUBLANES, (block_rows // SUBLANES) * SUBLANES)  # sublane-aligned
    grid = (pl.cdiv(rows, br),)             # ragged last block masked by Pallas

    cost = pl.CostEstimate(
        flops=2 * rows * LANES,
        bytes_accessed=2 * 4 * rows * LANES,  # one read + one write pass
        transcendentals=0,
    )

    y2d = pl.pallas_call(
        _linear_kernel,
        out_shape=jax.ShapeDtypeStruct((rows, LANES), x.dtype),
        grid=grid,
        in_specs=[
            pl.BlockSpec(memory_space=pltpu.MemorySpace.SMEM),  # w scalar
            pl.BlockSpec(memory_space=pltpu.MemorySpace.SMEM),  # b scalar
            pl.BlockSpec((br, LANES), lambda i: (i, 0)),         # x tile (lane-dense)
        ],
        out_specs=pl.BlockSpec((br, LANES), lambda i: (i, 0)),   # y tile (lane-dense)
        compiler_params=pltpu.CompilerParams(
            dimension_semantics=("parallel",),  # row grid shards across TCs on v7x
        ),
        cost_estimate=cost,
    )(w_s, b_s, x2d)

    y_flat = y2d.reshape(-1)
    if padded:
        y_flat = y_flat[:n]                 # drop only the <128 padded tail elems
    return y_flat.reshape(n, 1)


if __name__ == "__main__":
    key = jax.random.PRNGKey(0)
    kx, kw, kb = jax.random.split(key, 3)

    # Small shapes consistent with Linear(1, 1): batch of 8 samples, 1 feature.
    x = jax.random.normal(kx, (8, 1), dtype=jnp.float32)

    # Deterministic parameter init (mimics PyTorch's U(-1, 1) bound for fan_in=1).
    w = jax.random.uniform(kw, (1, 1), dtype=jnp.float32, minval=-1.0, maxval=1.0)
    b = jax.random.uniform(kb, (1,), dtype=jnp.float32, minval=-1.0, maxval=1.0)

    y_ref = x @ w.T + b

    # 1) Exercise the Pallas kernel at the module's small test shape.
    y = linear_1x1(x, w, b, force_pallas=True)
    jax.block_until_ready(y)
    assert y.shape == y_ref.shape, "shape mismatch vs reference"
    assert jnp.allclose(y, y_ref, atol=1e-6), "mismatch vs reference (pallas)"

    # 2) Small-N fast path (skips Pallas; fused XLA elementwise).
    y_fast = linear_1x1(x, w, b)
    assert jnp.allclose(y_fast, y_ref, atol=1e-6), "mismatch vs reference (fast path)"

    # 3) Lane-aligned N (no pad/slice in wrapper) and ragged N (masked tail).
    for n in (1024, 300):
        xb = jax.random.normal(jax.random.PRNGKey(n), (n, 1), dtype=jnp.float32)
        yb = linear_1x1(xb, w, b, force_pallas=True)
        jax.block_until_ready(yb)
        assert jnp.allclose(yb, xb @ w.T + b, atol=1e-6), f"mismatch at N={n}"

    print("KERNEL_OK")
</pallas_src>

<mosaic_0001>
module attributes {stable_mosaic.version = 11 : i64} {
  func.func @_linear_kernel(%arg0: i32, %arg1: memref<1xf32, #tpu.memory_space<smem>>, %arg2: memref<1xf32, #tpu.memory_space<smem>>, %arg3: memref<1x128xf32, #tpu.memory_space<vmem>>, %arg4: memref<1x128xf32, #tpu.memory_space<vmem>>) attributes {dimension_semantics = [#tpu.dimension_semantics<parallel>], iteration_bounds = array<i64: 1>, scalar_prefetch = 0 : i64, scratch_operands = 0 : i64, tpu.core_type = #tpu.core_type<tc>, window_params = [{transform_indices = @transform_0, window_bounds = array<i64: 1>}, {transform_indices = @transform_1, window_bounds = array<i64: 1>}, {transform_indices = @transform_2, window_bounds = array<i64: 1, 128>}, {transform_indices = @transform_3, window_bounds = array<i64: 1, 128>}]} {
    %c0 = arith.constant 0 : index
    %c0_0 = arith.constant 0 : index
    %0 = vector.load %arg3[%c0, %c0_0] : memref<1x128xf32, #tpu.memory_space<vmem>>, vector<1x128xf32>
    %c0_1 = arith.constant 0 : index
    %1 = memref.load %arg1[%c0_1] : memref<1xf32, #tpu.memory_space<smem>>
    %2 = vector.broadcast %1 : f32 to vector<1x128xf32>
    %3 = arith.mulf %0, %2 : vector<1x128xf32>
    %c0_2 = arith.constant 0 : index
    %4 = memref.load %arg2[%c0_2] : memref<1xf32, #tpu.memory_space<smem>>
    %5 = vector.broadcast %4 : f32 to vector<1x128xf32>
    %6 = arith.addf %3, %5 : vector<1x128xf32>
    %c0_3 = arith.constant 0 : index
    %c0_4 = arith.constant 0 : index
    %7 = vector.load %arg4[%c0_3, %c0_4] : memref<1x128xf32, #tpu.memory_space<vmem>>, vector<1x128xf32>
    tpu.vector_store %arg4[%c0_3, %c0_4], %6 {strides = array<i32>} : memref<1x128xf32, #tpu.memory_space<vmem>>, vector<1x128xf32>,
    return
  }
  func.func @transform_0(%arg0: i32) -> i32 {
    %c0_i32 = arith.constant 0 : i32
    %c0_i32_0 = arith.constant 0 : i32
    return %c0_i32 : i32
  }
  func.func @transform_1(%arg0: i32) -> i32 {
    %c0_i32 = arith.constant 0 : i32
    %c0_i32_0 = arith.constant 0 : i32
    return %c0_i32 : i32
  }
  func.func @transform_2(%arg0: i32) -> (i32, i32) {
    %c0_i32 = arith.constant 0 : i32
    %c0_i32_0 = arith.constant 0 : i32
    return %arg0, %c0_i32 : i32, i32
  }
  func.func @transform_3(%arg0: i32) -> (i32, i32) {
    %c0_i32 = arith.constant 0 : i32
    %c0_i32_0 = arith.constant 0 : i32
    return %arg0, %c0_i32 : i32, i32
  }
}

</mosaic_0001>

<bundles_post_ra>
// kernel: tpu_custom_call.1
= control target key start
LH: loop header
LB: loop body
LE: loop exit
PB: predicated region body
PF: predicated region fallthrough
CT: control target
= control target key end

     0   :  { %s101_s0 = inlined_call_operand.<no memory space> [shape: f32[1], index: 0, kind: input, shape index: {}]   ;;  %s102_s1 = inlined_call_operand.<no memory space> [shape: f32[1], index: 1, kind: input, shape index: {}]   ;;  %s103_s2 = inlined_call_operand.vmem [shape: f32[1,128], index: 2, kind: input, shape index: {}]   ;;  %s104_s3 = inlined_call_operand.hbm [shape: f32[1,128], index: 3, kind: output, shape index: {}]  }
   0x1   :  { %v17_v0 = vld [vmem:[%s103_s2] sm:$0x1]  ;;  %v19_v1 = vstv %s101_s0  ;;  %v22_v2 = vstv %s102_s1 }
   0x2   :  { %10 = vsyncpa [#allocation5], 0  ;;  %s32_s20 = sshll.u32 %s104_s3, 4  ;;  %v20_v3 = vmul.f32 %v19_v1, %v17_v0  ;;  %s68_s21 = smov [#allocation4]   ;;  %s33_s20 = int_to_ptr.hbm [resolvable:$true] %s32_s20 }
   0x3   :  { %s30_s22 = sshll.u32 %s68_s21, 4  ;;  %s31_s22 = int_to_ptr.vmem [resolvable:$true] %s30_s22 }
   0x4   :  { %v23_v4 = vadd.f32 %v22_v2, %v20_v3 }
   0x6   :  { %24 = vst [vmem:[#allocation4] sm:$0x1] %v23_v4 }
   0x7   :  { %35 = dma.vmem_to_hbm [thread:$0]  %s31_s22, 16, %s33_s20, [#allocation5]  }
   0x8   :  { %66 = dma.done.wait [#allocation5], 16  }
   0x9   :  { %67 = vsyncadd [#allocation5], 4294967280 }
   0xa   :  { %40 = vsyncpa [#allocation5], 1 }

</bundles_post_ra>
